<compile_context>
chip_gen: v7x
topology: tpu7x:2x2x1
jax: 0.10.0
libtpu: 0.0.40
codegen_flags: <defaults>
</compile_context>

<pallas_src>
import functools

import jax
import jax.numpy as jnp
from jax.experimental import pallas as pl
from jax.experimental.pallas import tpu as pltpu


_N_F32_TEMPS = 6    # s, t, e_s, e_t, (t - s), e_t*(t - s) full-tile f32 temps
_N_ROW_SCRATCH = 5  # m_s, m_t, z_s, z_t, w  (each lane-padded to 128 in VMEM)


def _distill_kernel(ys_ref, yt_ref, out_ref,
                    m_s_ref, m_t_ref, z_s_ref, z_t_ref, w_ref, *, inv_temp):
    """One grid step: a (block_b, block_c) tile of student+teacher logits.

    Class axis (pl.program_id(1)) runs an online softmax; on the last class
    block the per-row KL is finalized and this batch block's partial sum is
    broadcast into a lane-dense (1, 8, 128) output tile (unmasked store).
    """
    j = pl.program_id(1)

    @pl.when(j == 0)
    def _init():
        m_s_ref[...] = jnp.full_like(m_s_ref, -jnp.inf)
        m_t_ref[...] = jnp.full_like(m_t_ref, -jnp.inf)
        z_s_ref[...] = jnp.zeros_like(z_s_ref)
        z_t_ref[...] = jnp.zeros_like(z_t_ref)
        w_ref[...] = jnp.zeros_like(w_ref)

    s = ys_ref[...].astype(jnp.float32) * inv_temp
    t = yt_ref[...].astype(jnp.float32) * inv_temp

    # Online (flash-style) softmax statistics along the class/lane axis.
    m_s_new = jnp.maximum(m_s_ref[...], jnp.max(s, axis=-1, keepdims=True))
    m_t_new = jnp.maximum(m_t_ref[...], jnp.max(t, axis=-1, keepdims=True))
    a_s = jnp.exp(m_s_ref[...] - m_s_new)   # exp(-inf)=0 on the first block
    a_t = jnp.exp(m_t_ref[...] - m_t_new)

    e_s = jnp.exp(s - m_s_new)
    e_t = jnp.exp(t - m_t_new)

    # (v7x micro-opt left on the table: these three lane-axis sums could be
    #  routed to the idle MXU via a dot with a ones matrix if VALU-bound.)
    z_s_ref[...] = a_s * z_s_ref[...] + jnp.sum(e_s, axis=-1, keepdims=True)
    z_t_ref[...] = a_t * z_t_ref[...] + jnp.sum(e_t, axis=-1, keepdims=True)
    w_ref[...] = a_t * w_ref[...] + jnp.sum(e_t * (t - s), axis=-1, keepdims=True)
    m_s_ref[...] = m_s_new
    m_t_ref[...] = m_t_new

    @pl.when(j == pl.num_programs(1) - 1)
    def _finalize():
        # KL_row = W / Z_t - (M_t - M_s) + log Z_s - log Z_t
        # Exact divide on purpose: W/Z_t largely cancels against the other
        # terms, so an approximate reciprocal's error gets amplified (this is
        # what made the previous version miss the 1e-3 tolerance).
        kl_rows = (w_ref[...] / z_t_ref[...]
                   - (m_t_ref[...] - m_s_ref[...])
                   + (jnp.log(z_s_ref[...]) - jnp.log(z_t_ref[...])))
        out_ref[...] = jnp.full(out_ref.shape, jnp.sum(kl_rows), jnp.float32)


def _round_up(x, m):
    return ((x + m - 1) // m) * m


def _bytes_per_row(block_c, itemsize):
    """VMEM bytes consumed per batch row at class-tile width block_c."""
    staged = 2 * 2 * block_c * itemsize        # 2 inputs x 2 pipeline buffers
    temps = _N_F32_TEMPS * block_c * 4         # f32 compiler temps in the body
    scratch = _N_ROW_SCRATCH * 128 * 4         # online-softmax state (lane pad)
    return staged + temps + scratch


def _choose_blocks(B, C, itemsize, budget_bytes):
    """Pick (block_b, block_c) from a VMEM budget that covers DMA staging,
    the f32 intermediates and the per-row scratch."""
    row_align = max(8, 32 // itemsize)          # 8 rows f32, 16 bf16, 32 int8

    def rows_that_fit(bc):
        return budget_bytes // _bytes_per_row(bc, itemsize)

    # Class tile: full class axis if at least one aligned batch tile fits;
    # otherwise tile C with the largest multiple-of-128 divisor that fits.
    block_c = C
    if rows_that_fit(C) < row_align and C % 128 == 0:
        block_c = 128
        d = 128
        while d <= C:
            if C % d == 0 and rows_that_fit(d) >= row_align:
                block_c = d
            d += 128

    # Batch tile: largest aligned tile within budget (at most the padded batch).
    cap = max(row_align, (rows_that_fit(block_c) // row_align) * row_align)
    block_b = min(_round_up(B, row_align), cap)

    # Megacore (v7x): keep >= 2 batch blocks whenever the batch is splittable
    # so the "parallel" grid axis feeds both TensorCores.
    half = _round_up(pl.cdiv(B, 2), row_align)
    if half < _round_up(B, row_align):
        block_b = min(block_b, half)

    return block_b, block_c


def distill_loss(y_s, y_t, temp=16.0, block_b=None, block_c=None,
                 vmem_budget_bytes=12 << 20):
    """Pallas implementation of DistillLoss.forward. Returns a scalar f32.

    Inputs may stay in their storage dtype (e.g. bf16); the kernel upcasts
    in-register, so keep logits un-upcast at the call site (HBM-bound kernel:
    halving input bytes is ~2x wall clock on v5e/v6e).
    """
    assert y_s.shape == y_t.shape and y_s.ndim == 2
    B, C = y_s.shape
    itemsize = max(jnp.dtype(y_s.dtype).itemsize, jnp.dtype(y_t.dtype).itemsize)

    auto_b, auto_c = _choose_blocks(B, C, itemsize, vmem_budget_bytes)
    if block_b is None:
        block_b = auto_b
    if block_c is None:
        block_c = auto_c
    assert block_c == C or (C % block_c == 0 and block_c % 128 == 0), (
        "class tile must be the full class axis or a multiple-of-128 divisor")

    num_b = pl.cdiv(B, block_b)
    num_c = C // block_c

    # Tail handling: zero-pad the batch so the grid covers it exactly.
    # Zero-logit rows give a uniform softmax for both student and teacher,
    # i.e. exactly 0 KL, so padding does not change the summed loss.
    b_pad = num_b * block_b
    if b_pad != B:
        pad = b_pad - B
        y_s = jnp.pad(y_s, ((0, pad), (0, 0)))
        y_t = jnp.pad(y_t, ((0, pad), (0, 0)))

    # Per-step working set (staging + f32 temps + scratch + output buffers)
    # -> explicit scoped-VMEM limit so the chosen tile is actually realizable
    # on every generation (incl. v7x's smaller VMEM).
    working_set = (2 * 2 * block_b * block_c * itemsize
                   + _N_F32_TEMPS * block_b * block_c * 4
                   + _N_ROW_SCRATCH * block_b * 128 * 4
                   + 2 * 8 * 128 * 4)
    vmem_limit = int(max(working_set + (4 << 20), 16 << 20))

    kernel = functools.partial(_distill_kernel, inv_temp=1.0 / float(temp))

    partials = pl.pallas_call(
        kernel,
        out_shape=jax.ShapeDtypeStruct((num_b, 8, 128), jnp.float32),
        grid_spec=pltpu.PrefetchScalarGridSpec(
            num_scalar_prefetch=0,
            grid=(num_b, num_c),
            in_specs=[
                pl.BlockSpec((block_b, block_c), lambda i, j: (i, j)),
                pl.BlockSpec((block_b, block_c), lambda i, j: (i, j)),
            ],
            # Each batch block owns its own lane-dense output tile; the class
            # axis revisits it (accumulator pattern, written on the last step).
            out_specs=pl.BlockSpec((1, 8, 128), lambda i, j: (i, 0, 0)),
            scratch_shapes=[pltpu.VMEM((block_b, 1), jnp.float32)
                            for _ in range(_N_ROW_SCRATCH)],
        ),
        compiler_params=pltpu.CompilerParams(
            dimension_semantics=("parallel", "arbitrary"),
            vmem_limit_bytes=vmem_limit,
        ),
    )(y_s, y_t)

    scale = (float(temp) ** 2) / float(B)
    return jnp.sum(partials[:, 0, 0]) * scale


def _distill_loss_ref(y_s, y_t, temp=16.0):
    """Pure-JAX reference mirroring the PyTorch module."""
    log_p_s = jax.nn.log_softmax(y_s.astype(jnp.float32) / temp, axis=1)
    p_t = jax.nn.softmax(y_t.astype(jnp.float32) / temp, axis=1)
    kl = jnp.sum(p_t * (jnp.log(p_t) - log_p_s))
    return kl * (temp ** 2) / y_s.shape[0]


if __name__ == "__main__":
    key = jax.random.PRNGKey(0)
    k1, k2, k3, k4 = jax.random.split(key, 4)

    # 1) Basic path: auto tiling (2 batch blocks for megacore, 1 class block).
    B, C = 16, 128
    y_s = jax.random.normal(k1, (B, C), dtype=jnp.float32) * 3.0
    y_t = jax.random.normal(k2, (B, C), dtype=jnp.float32) * 3.0
    ref = _distill_loss_ref(y_s, y_t, temp=16.0)
    out = jax.block_until_ready(distill_loss(y_s, y_t, temp=16.0))
    assert jnp.allclose(out, ref, rtol=1e-3, atol=1e-3), (out, ref)

    # 2) Class-axis tiling: online softmax across 2 class blocks.
    B2, C2 = 16, 256
    y_s2 = jax.random.normal(k3, (B2, C2), dtype=jnp.float32) * 3.0
    y_t2 = jax.random.normal(k4, (B2, C2), dtype=jnp.float32) * 3.0
    ref2 = _distill_loss_ref(y_s2, y_t2, temp=16.0)
    out2 = jax.block_until_ready(
        distill_loss(y_s2, y_t2, temp=16.0, block_b=8, block_c=128))
    assert jnp.allclose(out2, ref2, rtol=1e-3, atol=1e-3), (out2, ref2)

    # 3) Ragged batch (tail zero-padded in the wrapper) + bf16 storage dtype.
    B3 = 10
    y_s3 = (jax.random.normal(k1, (B3, C), jnp.float32) * 3.0).astype(jnp.bfloat16)
    y_t3 = (jax.random.normal(k2, (B3, C), jnp.float32) * 3.0).astype(jnp.bfloat16)
    ref3 = _distill_loss_ref(y_s3, y_t3, temp=16.0)
    out3 = jax.block_until_ready(distill_loss(y_s3, y_t3, temp=16.0))
    assert jnp.allclose(out3, ref3, rtol=1e-3, atol=1e-3), (out3, ref3)

    print("KERNEL_OK")
</pallas_src>

<mosaic_0001>
module attributes {stable_mosaic.version = 11 : i64} {
  func.func @_distill_kernel(%arg0: i32, %arg1: i32, %arg2: memref<8x128xf32, #tpu.memory_space<vmem>>, %arg3: memref<8x128xf32, #tpu.memory_space<vmem>>, %arg4: memref<1x8x128xf32, #tpu.memory_space<vmem>>, %arg5: memref<8x1xf32, #tpu.memory_space<vmem>>, %arg6: memref<8x1xf32, #tpu.memory_space<vmem>>, %arg7: memref<8x1xf32, #tpu.memory_space<vmem>>, %arg8: memref<8x1xf32, #tpu.memory_space<vmem>>, %arg9: memref<8x1xf32, #tpu.memory_space<vmem>>) attributes {dimension_semantics = [#tpu.dimension_semantics<parallel>, #tpu.dimension_semantics<arbitrary>], iteration_bounds = array<i64: 2, 1>, scalar_prefetch = 0 : i64, scratch_operands = 5 : i64, tpu.core_type = #tpu.core_type<tc>, window_params = [{transform_indices = @transform_0, window_bounds = array<i64: 8, 128>}, {transform_indices = @transform_1, window_bounds = array<i64: 8, 128>}, {transform_indices = @transform_2, window_bounds = array<i64: 1, 8, 128>}]} {
    %c0_i32 = arith.constant 0 : i32
    %0 = arith.cmpi eq, %arg1, %c0_i32 : i32
    %1 = arith.extui %0 : i1 to i32
    %c0_i32_0 = arith.constant 0 : i32
    %2 = arith.cmpi ne, %1, %c0_i32_0 : i32
    scf.if %2 {
      %cst_36 = arith.constant 0xFF800000 : f32
      %54 = vector.broadcast %cst_36 : f32 to vector<8x1xf32>
      %c0_37 = arith.constant 0 : index
      %c0_38 = arith.constant 0 : index
      %55 = vector.load %arg5[%c0_37, %c0_38] : memref<8x1xf32, #tpu.memory_space<vmem>>, vector<8x1xf32>
      tpu.vector_store %arg5[%c0_37, %c0_38], %54 {strides = array<i32>} : memref<8x1xf32, #tpu.memory_space<vmem>>, vector<8x1xf32>,
      %cst_39 = arith.constant 0xFF800000 : f32
      %56 = vector.broadcast %cst_39 : f32 to vector<8x1xf32>
      %c0_40 = arith.constant 0 : index
      %c0_41 = arith.constant 0 : index
      %57 = vector.load %arg6[%c0_40, %c0_41] : memref<8x1xf32, #tpu.memory_space<vmem>>, vector<8x1xf32>
      tpu.vector_store %arg6[%c0_40, %c0_41], %56 {strides = array<i32>} : memref<8x1xf32, #tpu.memory_space<vmem>>, vector<8x1xf32>,
      %cst_42 = arith.constant 0.000000e+00 : f32
      %58 = vector.broadcast %cst_42 : f32 to vector<8x1xf32>
      %c0_43 = arith.constant 0 : index
      %c0_44 = arith.constant 0 : index
      %59 = vector.load %arg7[%c0_43, %c0_44] : memref<8x1xf32, #tpu.memory_space<vmem>>, vector<8x1xf32>
      tpu.vector_store %arg7[%c0_43, %c0_44], %58 {strides = array<i32>} : memref<8x1xf32, #tpu.memory_space<vmem>>, vector<8x1xf32>,
      %cst_45 = arith.constant 0.000000e+00 : f32
      %60 = vector.broadcast %cst_45 : f32 to vector<8x1xf32>
      %c0_46 = arith.constant 0 : index
      %c0_47 = arith.constant 0 : index
      %61 = vector.load %arg8[%c0_46, %c0_47] : memref<8x1xf32, #tpu.memory_space<vmem>>, vector<8x1xf32>
      tpu.vector_store %arg8[%c0_46, %c0_47], %60 {strides = array<i32>} : memref<8x1xf32, #tpu.memory_space<vmem>>, vector<8x1xf32>,
      %cst_48 = arith.constant 0.000000e+00 : f32
      %62 = vector.broadcast %cst_48 : f32 to vector<8x1xf32>
      %c0_49 = arith.constant 0 : index
      %c0_50 = arith.constant 0 : index
      %63 = vector.load %arg9[%c0_49, %c0_50] : memref<8x1xf32, #tpu.memory_space<vmem>>, vector<8x1xf32>
      tpu.vector_store %arg9[%c0_49, %c0_50], %62 {strides = array<i32>} : memref<8x1xf32, #tpu.memory_space<vmem>>, vector<8x1xf32>,
    } else {
    }
    %c0 = arith.constant 0 : index
    %c0_1 = arith.constant 0 : index
    %3 = vector.load %arg2[%c0, %c0_1] : memref<8x128xf32, #tpu.memory_space<vmem>>, vector<8x128xf32>
    %cst = arith.constant 6.250000e-02 : f32
    %4 = vector.broadcast %cst : f32 to vector<8x128xf32>
    %5 = arith.mulf %3, %4 : vector<8x128xf32>
    %c0_2 = arith.constant 0 : index
    %c0_3 = arith.constant 0 : index
    %6 = vector.load %arg3[%c0_2, %c0_3] : memref<8x128xf32, #tpu.memory_space<vmem>>, vector<8x128xf32>
    %cst_4 = arith.constant 6.250000e-02 : f32
    %7 = vector.broadcast %cst_4 : f32 to vector<8x128xf32>
    %8 = arith.mulf %6, %7 : vector<8x128xf32>
    %c0_5 = arith.constant 0 : index
    %c0_6 = arith.constant 0 : index
    %9 = vector.load %arg5[%c0_5, %c0_6] : memref<8x1xf32, #tpu.memory_space<vmem>>, vector<8x1xf32>
    %cst_7 = arith.constant dense<0xFF800000> : vector<8xf32>
    %10 = vector.multi_reduction <maximumf>, %5, %cst_7 [1] : vector<8x128xf32> to vector<8xf32>
    %11 = vector.shape_cast %10 : vector<8xf32> to vector<8x1xf32>
    %12 = arith.maximumf %9, %11 : vector<8x1xf32>
    %c0_8 = arith.constant 0 : index
    %c0_9 = arith.constant 0 : index
    %13 = vector.load %arg6[%c0_8, %c0_9] : memref<8x1xf32, #tpu.memory_space<vmem>>, vector<8x1xf32>
    %cst_10 = arith.constant dense<0xFF800000> : vector<8xf32>
    %14 = vector.multi_reduction <maximumf>, %8, %cst_10 [1] : vector<8x128xf32> to vector<8xf32>
    %15 = vector.shape_cast %14 : vector<8xf32> to vector<8x1xf32>
    %16 = arith.maximumf %13, %15 : vector<8x1xf32>
    %c0_11 = arith.constant 0 : index
    %c0_12 = arith.constant 0 : index
    %17 = vector.load %arg5[%c0_11, %c0_12] : memref<8x1xf32, #tpu.memory_space<vmem>>, vector<8x1xf32>
    %18 = arith.subf %17, %12 : vector<8x1xf32>
    %19 = math.exp %18 : vector<8x1xf32>
    %c0_13 = arith.constant 0 : index
    %c0_14 = arith.constant 0 : index
    %20 = vector.load %arg6[%c0_13, %c0_14] : memref<8x1xf32, #tpu.memory_space<vmem>>, vector<8x1xf32>
    %21 = arith.subf %20, %16 : vector<8x1xf32>
    %22 = math.exp %21 : vector<8x1xf32>
    %23 = vector.broadcast %12 : vector<8x1xf32> to vector<8x128xf32>
    %24 = arith.subf %5, %23 : vector<8x128xf32>
    %25 = math.exp %24 : vector<8x128xf32>
    %26 = vector.broadcast %16 : vector<8x1xf32> to vector<8x128xf32>
    %27 = arith.subf %8, %26 : vector<8x128xf32>
    %28 = math.exp %27 : vector<8x128xf32>
    %c0_15 = arith.constant 0 : index
    %c0_16 = arith.constant 0 : index
    %29 = vector.load %arg7[%c0_15, %c0_16] : memref<8x1xf32, #tpu.memory_space<vmem>>, vector<8x1xf32>
    %30 = arith.mulf %19, %29 : vector<8x1xf32>
    %cst_17 = arith.constant dense<0.000000e+00> : vector<8xf32>
    %31 = vector.multi_reduction <add>, %25, %cst_17 [1] : vector<8x128xf32> to vector<8xf32>
    %32 = vector.shape_cast %31 : vector<8xf32> to vector<8x1xf32>
    %33 = arith.addf %30, %32 : vector<8x1xf32>
    %c0_18 = arith.constant 0 : index
    %c0_19 = arith.constant 0 : index
    %34 = vector.load %arg7[%c0_18, %c0_19] : memref<8x1xf32, #tpu.memory_space<vmem>>, vector<8x1xf32>
    tpu.vector_store %arg7[%c0_18, %c0_19], %33 {strides = array<i32>} : memref<8x1xf32, #tpu.memory_space<vmem>>, vector<8x1xf32>,
    %c0_20 = arith.constant 0 : index
    %c0_21 = arith.constant 0 : index
    %35 = vector.load %arg8[%c0_20, %c0_21] : memref<8x1xf32, #tpu.memory_space<vmem>>, vector<8x1xf32>
    %36 = arith.mulf %22, %35 : vector<8x1xf32>
    %cst_22 = arith.constant dense<0.000000e+00> : vector<8xf32>
    %37 = vector.multi_reduction <add>, %28, %cst_22 [1] : vector<8x128xf32> to vector<8xf32>
    %38 = vector.shape_cast %37 : vector<8xf32> to vector<8x1xf32>
    %39 = arith.addf %36, %38 : vector<8x1xf32>
    %c0_23 = arith.constant 0 : index
    %c0_24 = arith.constant 0 : index
    %40 = vector.load %arg8[%c0_23, %c0_24] : memref<8x1xf32, #tpu.memory_space<vmem>>, vector<8x1xf32>
    tpu.vector_store %arg8[%c0_23, %c0_24], %39 {strides = array<i32>} : memref<8x1xf32, #tpu.memory_space<vmem>>, vector<8x1xf32>,
    %c0_25 = arith.constant 0 : index
    %c0_26 = arith.constant 0 : index
    %41 = vector.load %arg9[%c0_25, %c0_26] : memref<8x1xf32, #tpu.memory_space<vmem>>, vector<8x1xf32>
    %42 = arith.mulf %22, %41 : vector<8x1xf32>
    %43 = arith.subf %8, %5 : vector<8x128xf32>
    %44 = arith.mulf %28, %43 : vector<8x128xf32>
    %cst_27 = arith.constant dense<0.000000e+00> : vector<8xf32>
    %45 = vector.multi_reduction <add>, %44, %cst_27 [1] : vector<8x128xf32> to vector<8xf32>
    %46 = vector.shape_cast %45 : vector<8xf32> to vector<8x1xf32>
    %47 = arith.addf %42, %46 : vector<8x1xf32>
    %c0_28 = arith.constant 0 : index
    %c0_29 = arith.constant 0 : index
    %48 = vector.load %arg9[%c0_28, %c0_29] : memref<8x1xf32, #tpu.memory_space<vmem>>, vector<8x1xf32>
    tpu.vector_store %arg9[%c0_28, %c0_29], %47 {strides = array<i32>} : memref<8x1xf32, #tpu.memory_space<vmem>>, vector<8x1xf32>,
    %c0_30 = arith.constant 0 : index
    %c0_31 = arith.constant 0 : index
    %49 = vector.load %arg5[%c0_30, %c0_31] : memref<8x1xf32, #tpu.memory_space<vmem>>, vector<8x1xf32>
    tpu.vector_store %arg5[%c0_30, %c0_31], %12 {strides = array<i32>} : memref<8x1xf32, #tpu.memory_space<vmem>>, vector<8x1xf32>,
    %c0_32 = arith.constant 0 : index
    %c0_33 = arith.constant 0 : index
    %50 = vector.load %arg6[%c0_32, %c0_33] : memref<8x1xf32, #tpu.memory_space<vmem>>, vector<8x1xf32>
    tpu.vector_store %arg6[%c0_32, %c0_33], %16 {strides = array<i32>} : memref<8x1xf32, #tpu.memory_space<vmem>>, vector<8x1xf32>,
    %c0_i32_34 = arith.constant 0 : i32
    %51 = arith.cmpi eq, %arg1, %c0_i32_34 : i32
    %52 = arith.extui %51 : i1 to i32
    %c0_i32_35 = arith.constant 0 : i32
    %53 = arith.cmpi ne, %52, %c0_i32_35 : i32
    scf.if %53 {
      %c0_36 = arith.constant 0 : index
      %c0_37 = arith.constant 0 : index
      %54 = vector.load %arg9[%c0_36, %c0_37] : memref<8x1xf32, #tpu.memory_space<vmem>>, vector<8x1xf32>
      %c0_38 = arith.constant 0 : index
      %c0_39 = arith.constant 0 : index
      %55 = vector.load %arg8[%c0_38, %c0_39] : memref<8x1xf32, #tpu.memory_space<vmem>>, vector<8x1xf32>
      %56 = arith.divf %54, %55 : vector<8x1xf32>
      %c0_40 = arith.constant 0 : index
      %c0_41 = arith.constant 0 : index
      %57 = vector.load %arg6[%c0_40, %c0_41] : memref<8x1xf32, #tpu.memory_space<vmem>>, vector<8x1xf32>
      %c0_42 = arith.constant 0 : index
      %c0_43 = arith.constant 0 : index
      %58 = vector.load %arg5[%c0_42, %c0_43] : memref<8x1xf32, #tpu.memory_space<vmem>>, vector<8x1xf32>
      %59 = arith.subf %57, %58 : vector<8x1xf32>
      %60 = arith.subf %56, %59 : vector<8x1xf32>
      %c0_44 = arith.constant 0 : index
      %c0_45 = arith.constant 0 : index
      %61 = vector.load %arg7[%c0_44, %c0_45] : memref<8x1xf32, #tpu.memory_space<vmem>>, vector<8x1xf32>
      %62 = math.log %61 : vector<8x1xf32>
      %c0_46 = arith.constant 0 : index
      %c0_47 = arith.constant 0 : index
      %63 = vector.load %arg8[%c0_46, %c0_47] : memref<8x1xf32, #tpu.memory_space<vmem>>, vector<8x1xf32>
      %64 = math.log %63 : vector<8x1xf32>
      %65 = arith.subf %62, %64 : vector<8x1xf32>
      %66 = arith.addf %60, %65 : vector<8x1xf32>
      %67 = vector.shape_cast %66 : vector<8x1xf32> to vector<1x8x1xf32>
      %cst_48 = arith.constant dense<0.000000e+00> : vector<1xf32>
      %68 = vector.multi_reduction <add>, %67, %cst_48 [1, 2] : vector<1x8x1xf32> to vector<1xf32>
      %69 = vector.shape_cast %68 : vector<1xf32> to vector<1x1x1xf32>
      %70 = vector.extract %69[0, 0, 0] : f32 from vector<1x1x1xf32>
      %71 = vector.broadcast %70 : f32 to vector<1x8x128xf32>
      %c0_49 = arith.constant 0 : index
      %c0_50 = arith.constant 0 : index
      %c0_51 = arith.constant 0 : index
      %72 = vector.load %arg4[%c0_49, %c0_50, %c0_51] : memref<1x8x128xf32, #tpu.memory_space<vmem>>, vector<1x8x128xf32>
      tpu.vector_store %arg4[%c0_49, %c0_50, %c0_51], %71 {strides = array<i32>} : memref<1x8x128xf32, #tpu.memory_space<vmem>>, vector<1x8x128xf32>,
    } else {
    }
    return
  }
  func.func @transform_0(%arg0: i32, %arg1: i32) -> (i32, i32) {
    %c0_i32 = arith.constant 0 : i32
    return %arg0, %arg1 : i32, i32
  }
  func.func @transform_1(%arg0: i32, %arg1: i32) -> (i32, i32) {
    %c0_i32 = arith.constant 0 : i32
    return %arg0, %arg1 : i32, i32
  }
  func.func @transform_2(%arg0: i32, %arg1: i32) -> (i32, i32, i32) {
    %c0_i32 = arith.constant 0 : i32
    %c0_i32_0 = arith.constant 0 : i32
    %c0_i32_1 = arith.constant 0 : i32
    return %arg0, %c0_i32, %c0_i32_0 : i32, i32, i32
  }
}

</mosaic_0001>

<bundles_post_ra>
// kernel: tpu_custom_call.1
= control target key start
LH: loop header
LB: loop body
LE: loop exit
PB: predicated region body
PF: predicated region fallthrough
CT: control target
= control target key end

     0   :  { %7 = vsyncpa [#allocation8], 0  ;;  %s937_s0 = inlined_call_operand.hbm [shape: f32[16,128], index: 0, kind: input, shape index: {}]   ;;  %s938_s1 = inlined_call_operand.hbm [shape: f32[16,128], index: 1, kind: input, shape index: {}]   ;;  %s939_s2 = inlined_call_operand.hbm [shape: f32[2,8,128], index: 2, kind: output, shape index: {}]  }
   0x1   :  { %9 = vsyncpa [#allocation8 + $0x1], 0 }
   0x2   :  { %10 = vsyncpa [#allocation11], 0 }
   0x3   :  { %12 = vsyncpa [#allocation11 + $0x1], 0 }
   0x4   :  { %13 = vsyncpa [#allocation9], 0 }
   0x5   :  { %15 = vsyncpa [#allocation9 + $0x1], 0  ;;  %s701_s9 = smov 0   ;;  %s703_s10 = smov 0  }
   0x6   :  { %s705_s11 = smov 0   ;;  %s707_s12 = smov 0  }
   0x7   :  { %s709_s13 = smov 0   ;;  %s711_s14 = smov 0  }
   0x8 LB: > { %s428_s15 = sadd.s32 4294967295, %s678_s14   ;;  %s429_s16 = sadd.s32 4294967294, %s678_s14   ;;  %s678_s14 = sphi %s711_s14, %s21_s14   ;;  %s674_s13 = sphi %s709_s13, %s959_s13   ;;  %s670_s12 = sphi %s707_s12, %s958_s12   ;;  %s666_s11 = sphi %s705_s11, %s957_s11   ;;  %s662_s10 = sphi %s703_s10, %s956_s10   ;;  %s658_s9 = sphi %s701_s9, %s955_s9  }
   0x9   : > { %s33_s17 = sadd.s32 1, %s674_s13  ;;  %s42_s18 = sadd.s32 1, %s666_s11 }
   0xa   : > { %p35_p0 = scmp.ge.s32.totalorder %s33_s17, 2  ;;  %p49_p1 = scmp.ne.s32.totalorder %s666_s11, %s662_s10 }
   0xb   : > { %p50_p2 = scmp.eq.s32.totalorder %s678_s14, 0  ;;  %p55_p3 = scmp.ne.s32.totalorder %s662_s10, %s658_s9 }
   0xc   : > { %s961_s17 = smov (%p35_p0, %s33_s17), 0  ;;  %p56_p5 = scmp.eq.s32.totalorder %s428_s15, 0 }
   0xd   : > { %p742_p4 = por %p50_p2, %p49_p1  ;;  %s37_s20 = ssub.s32 %s674_s13, %s961_s17 }
   0xe   : > { %p107_p6 = scmp.eq.s32.totalorder %s428_s15, 1  ;;  %p40_p7 = scmp.eq.s32.totalorder %s37_s20, 0 }
   0xf   : > { %p748_p8 = por %p56_p5, %p55_p3  ;;  %p113_p10 = scmp.eq.s32.totalorder %s429_s16, 1 }
  0x10   : > { %p752_p9 = por %p107_p6, %p49_p1  ;;  %p463_p13 = scmp.lt.s32.totalorder %s678_s14, 2 }
  0x11   : > { %s943_s21 = scalar_select %p748_p8, 1, 0 }
  0x12   : > { %s944_s22 = scalar_select %p752_p9, 1, 0 }
  0x13   : > { %s757_s23 = scalar_select %p40_p7, %s666_s11, %s42_s18  }
  0x14   : > { %p759_p11 = por %p113_p10, %p55_p3  ;;  %s766_s25 = sand.u32 1, %s666_s11  }
  0x15   : > { %s432_s26 = sshll.u32 %s766_s25, 3  ;;  %s433_s27 = sshll.u32 %s674_s13, 7 }
  0x16   : > { %s945_s24 = scalar_select %p759_p11, 1, 0 }
  0x17   : > { %s775_s30 = scalar_lea.hbm %s937_s0, %s433_s27  ;;  %s137_s3 = scalar_lea.vmem [#allocation7], %s432_s26 }
  0x18   : > { %s145_s4 = sshll.u32 %s137_s3, 4  ;;  %p783_p0 = pnand %p463_p13, %p742_p4  ;;  %s779_s4 = int_to_ptr.vmem [resolvable:$true] %s145_s4 }
  0x19   : > { %s134_s6 = scalar_lea.sflag [#allocation8], %s766_s25  ;;  %s532_s7 = scalar_lea.hbm %s775_s30, 128 }
  0x1a   : > { %p533_p3 = scmp.ne.s32.totalorder %s775_s30, %s532_s7  ;;  %p534_p5 = pneg %p783_p0 }
  0x1b   : > { %s537_s16 = scalar_lea.hbm %s937_s0, 256  ;;  %p538_p4 = scmp.lt.u32.totalorder %s775_s30, %s937_s0 }
  0x1c   : > { %p535_p6 = pnand %p534_p5, %p533_p3  ;;  %p539_p10 = scmp.lt.u32.totalorder %s537_s16, %s532_s7 }
  0x1d   : > { %p541_p12 = scmp.lt.u32.totalorder %s532_s7, %s775_s30 }
  0x1e   : > { %p536_p7 = pneg %p535_p6  ;;  %p540_p13 = por %p539_p10, %p538_p4 }
  0x20   : > { %p542_p1 = por %p541_p12, %p540_p13 }
  0x22   : > { %p543_p2 = pnand %p542_p1, %p536_p7 }
  0x24   : > { %546 = shalt.err (!%p543_p2)
}
  0x25   : > { %s547_s20 = scalar_lea.vmem %s779_s4, 128  ;;  %s680_s28 = smov [#allocation7]  }
  0x26   : > { %p548_p3 = scmp.ne.s32.totalorder %s779_s4, %s547_s20  ;;  %s552_s29 = sshll.u32 %s680_s28, 4  ;;  %s553_s29 = int_to_ptr.vmem [resolvable:$false] %s552_s29 }
  0x27   : > { %s554_s3 = scalar_lea.vmem %s553_s29, 256  ;;  %p555_p9 = scmp.lt.s32.totalorder %s779_s4, %s553_s29 }
  0x28   : > { %p550_p6 = pnand %p548_p3, %p534_p5  ;;  %p556_p4 = scmp.lt.s32.totalorder %s554_s3, %s547_s20 }
  0x2a   : > { %p551_p11 = pneg %p550_p6  ;;  %p557_p10 = por %p556_p4, %p555_p9 }
  0x2c   : > { %p558_p12 = pnand %p557_p10, %p551_p11 }
  0x2e   : > { %561 = shalt.err (!%p558_p12)
}
  0x2f   : > { %455 = dma.hbm_to_vmem [thread:$0]  (!%p783_p0), %s775_s30, 128, %s779_s4, %s134_s6  }
  0x30   : > { %p947_p1 = scmp.lt.s32.totalorder %s678_s14, 3  ;;  %p948_p2 = scmp.ge.s32.totalorder %s678_s14, 1 }
  0x31   : > { %s828_s16 = scalar_lea.hbm %s938_s1, %s433_s27  ;;  %s156_s18 = scalar_lea.vmem [#allocation10], %s432_s26 }
  0x32   : > { %p819_p7 = pnand %p948_p2, %p947_p1  ;;  %s164_s19 = sshll.u32 %s156_s18, 4  ;;  %s165_s19 = int_to_ptr.vmem [resolvable:$true] %s164_s19 }
  0x33   : > { %s153_s30 = scalar_lea.sflag [#allocation11], %s766_s25  ;;  %s562_s4 = scalar_lea.hbm %s828_s16, 128 }
  0x34   : > { %s949_s7 = scalar_select %p819_p7, 1, 0 }
  0x35   : > { %p563_p9 = scmp.ne.s32.totalorder %s828_s16, %s562_s4  ;;  %s567_s27 = scalar_lea.hbm %s938_s1, 256 }
  0x36   : > { %p568_p3 = scmp.lt.u32.totalorder %s828_s16, %s938_s1  ;;  %p569_p6 = scmp.lt.u32.totalorder %s567_s27, %s562_s4 }
  0x37   : > { %p565_p11 = pnand %p563_p9, %p534_p5  ;;  %p571_p10 = scmp.lt.u32.totalorder %s562_s4, %s828_s16 }
  0x38   : > { %p570_p4 = por %p569_p6, %p568_p3 }
  0x39   : > { %p566_p13 = pneg %p565_p11 }
  0x3a   : > { %p572_p12 = por %p571_p10, %p570_p4 }
  0x3c   : > { %p573_p1 = pnand %p572_p12, %p566_p13 }
  0x3e   : > { %576 = shalt.err (!%p573_p1)
}
  0x3f   : > { %s577_s25 = scalar_lea.vmem %s165_s19, 128  ;;  %s681_s26 = smov [#allocation10]  }
  0x40   : > { %p578_p2 = scmp.ne.s32.totalorder %s165_s19, %s577_s25  ;;  %s582_s3 = sshll.u32 %s681_s26, 4  ;;  %s583_s3 = int_to_ptr.vmem [resolvable:$false] %s582_s3 }
  0x41   : > { %s584_s8 = scalar_lea.vmem %s583_s3, 256  ;;  %p585_p8 = scmp.lt.s32.totalorder %s165_s19, %s583_s3 }
  0x42   : > { %p580_p9 = pnand %p578_p2, %p534_p5  ;;  %p586_p7 = scmp.lt.s32.totalorder %s584_s8, %s577_s25 }
  0x44   : > { %p581_p11 = pneg %p580_p9  ;;  %p587_p3 = por %p586_p7, %p585_p8 }
  0x46   : > { %p588_p6 = pnand %p587_p3, %p581_p11 }
  0x48   : > { %591 = shalt.err (!%p588_p6)
}
  0x49   : > { %458 = dma.hbm_to_vmem [thread:$0]  (!%p783_p0), %s828_s16, 128, %s165_s19, %s153_s30  }
  0x4a   : > { %p950_p13 = scmp.ne.s32.totalorder %s949_s7, 0 }
  0x4b   : > { %s855_s15 = sand.u32 (!%p950_p13), 1, %s662_s10   ;;  %p951_p8 = scmp.ne.s32.totalorder (!%p950_p13), %s943_s21, 0 }
  0x4c   : > { %173 = sbr.rel (%p950_p13) target bundleno = 770 (0x302), region = 28  ;;  %s858_s18 = sshll.u32 (!%p950_p13), %s855_s15, 3 }
  0x4d   : > { %s176_s4 = scalar_lea.sflag (!%p950_p13), [#allocation8], %s855_s15  ;;  %s179_s6 = scalar_lea.vmem (!%p950_p13), [#allocation7], %s858_s18 }
  0x53   : > { %645 = dma.done.wait (%p951_p8), %s176_s4, 128  }
  0x54   : > { %647 = vsyncadd (%p951_p8), %s176_s4, 4294967168  ;;  %s185_s5 = scalar_lea.sflag [#allocation11], %s855_s15  ;;  %s188_s7 = scalar_lea.vmem [#allocation10], %s858_s18 }
  0x55   : > { %649 = dma.done.wait (%p951_p8), %s185_s5, 128  }
  0x56   : > { %651 = vsyncadd (%p951_p8), %s185_s5, 4294967168  ;;  %vm218_vm0 = vcmask 7168   ;;  %v682_v0 = vmov -inf   ;;  %v224_v1 = vld [vmem:[%s179_s6] sm:$0xff]  ;;  %v226_v2 = vld [vmem:[%s188_s7] sm:$0xff]  ;;  %v683_v5 = vmov 0  }
  0x57   : > { %219 = vst.msk [vmem:[#allocation2] sm:$0xff] %vm218_vm0, %v682_v0  ;;  %220 = vst.msk [vmem:[#allocation3] sm:$0xff] %vm218_vm0, %v682_v0  ;;  %v225_v3 = vmul.f32 0.0625, %v224_v1  ;;  %v227_v4 = vmul.f32 0.0625, %v226_v2  ;;  %516 = vset.pattern.permute.xlu1 %v683_v5  ;;  %517 = vset.pattern.permute.xlu0 %v683_v5  ;;  %v684_v6 = vmov 0.0   ;;  %s213_s21 = scalar_lea.vmem [#allocation12], %s858_s18 }
  0x58   : > { %221 = vst.msk [vmem:[#allocation4] sm:$0xff] %vm218_vm0, %v684_v6  ;;  %222 = vst.msk [vmem:[#allocation5] sm:$0xff] %vm218_vm0, %v684_v6  ;;  %s325_s16 = sshll.u32 %s213_s21, 4  ;;  %s441_s19 = sshll.u32 %s670_s12, 7  ;;  %s885_s16 = int_to_ptr.vmem [resolvable:$true] %s325_s16 }
  0x59   : > { %229 = vmax.xlane.f32.xlu0 %v225_v3  ;;  %223 = vst.msk [vmem:[#allocation6] sm:$0xff] %vm218_vm0, %v684_v6  ;;  %v273_v22 = vsub.f32 %v227_v4, %v225_v3  ;;  %s890_s28 = scalar_lea.hbm %s939_s2, %s441_s19  ;;  %s312_s29 = scalar_lea.sflag [#allocation9], %s855_s15 }
  0x5a   : > { %s592_s25 = scalar_lea.vmem %s885_s16, 128  ;;  %p952_p5 = scmp.ne.s32.totalorder %s944_s22, 0 }
  0x5b   : > { %p593_p0 = scmp.ne.s32.totalorder %s885_s16, %s592_s25  ;;  %s685_s12 = smov [#allocation12]  }
  0x5c   : > { %s596_s26 = sshll.u32 %s685_s12, 4  ;;  %s597_s26 = int_to_ptr.vmem [resolvable:$false] %s596_s26 }
  0x5d   : > { %233 = vmax.xlane.f32.xlu0 %v227_v4  ;;  %p594_p7 = pnand %p593_p0, %p952_p5  ;;  %s598_s3 = scalar_lea.vmem %s597_s26, 256 }
  0x5e   : > { %v228_v7 = vld [vmem:[#allocation2] sm:$0xff]  ;;  %v232_v10 = vld [vmem:[#allocation3] sm:$0xff]  ;;  %p599_p10 = scmp.lt.s32.totalorder %s885_s16, %s597_s26  ;;  %p600_p12 = scmp.lt.s32.totalorder %s598_s3, %s592_s25 }
  0x5f   : > { %v258_v28 = vld [vmem:[#allocation4] sm:$0xff]  ;;  %v265_v32 = vld [vmem:[#allocation5] sm:$0xff]  ;;  %p595_p4 = pneg %p594_p7 }
  0x60   : > { %v271_v34 = vld [vmem:[#allocation6] sm:$0xff]  ;;  %p601_p1 = por %p600_p12, %p599_p10 }
  0x62   : > { %p602_p2 = pnand %p601_p1, %p595_p4 }
  0xe6   : > { %v230_v8 = vpop.xlane.xlu0 %229 }
  0xe7   : > { %v231_v9 = vmax.f32 %v228_v7, %v230_v8 }
  0xe9   : > { %v236_v11 = vsub.f32 %v228_v7, %v231_v9  ;;  %279 = vst.msk [vmem:[#allocation2] sm:$0xff] %vm218_vm0, %v231_v9  ;;  %244 = vperm.xlu1 %516, %v231_v9  }
  0xea   : > { %v234_v12 = vpop.xlane.xlu0 %233 }
  0xeb   : > { %v235_v13 = vmax.f32 %v232_v10, %v234_v12  ;;  %v237_v25 = vmul.f32 1.442695, %v236_v11 }
  0xed   : > { %v239_v14 = vsub.f32 %v232_v10, %v235_v13  ;;  %280 = vst.msk [vmem:[#allocation3] sm:$0xff] %vm218_vm0, %v235_v13  ;;  %252 = vperm.xlu1 %516, %v235_v13  }
  0xef   : > { %v240_v26 = vmul.f32 1.442695, %v239_v14 }
  0xf0   : > { %v289_v47 = vld [vmem:[#allocation2] sm:$0xff] }
  0xf4   : > { %v288_v43 = vld [vmem:[#allocation3] sm:$0xff] }
  0xf5   : > { %v290_v50 = vsub.f32 %v288_v43, %v289_v47 }
 0x168   : > { %v245_v15 = vpop.permute.xlu1 %244 }
 0x169   : > { %v247_v16 = vsub.f32 %v225_v3, %v245_v15 }
 0x16b   : > { %v248_v17 = vmul.f32 1.442695, %v247_v16 }
 0x16c   : > { %v253_v18 = vpop.permute.xlu1 %252 }
 0x16d   : > { %518 = vpow2.f32 %v248_v17  ;;  %v255_v19 = vsub.f32 %v227_v4, %v253_v18 }
 0x16f   : > { %v256_v20 = vmul.f32 1.442695, %v255_v19 }
 0x171   : > { %520 = vpow2.f32 %v256_v20 }
 0x172   : > { %522 = vpow2.f32 %v237_v25 }
 0x173   : > { %524 = vpow2.f32 %v240_v26 }
 0x177   : > { %v519_v21 = vpop.eup %518 }
 0x178   : > { %260 = vadd.xlane.f32.xlu0 %v519_v21 }
 0x17b   : > { %v521_v23 = vpop.eup %520 }
 0x17c   : > { %267 = vadd.xlane.f32.xlu1 %v521_v23  ;;  %v274_v24 = vmul.f32 %v521_v23, %v273_v22  ;;  %v523_v27 = vpop.eup %522 }
 0x17d   : > { %v259_v29 = vmul.f32 %v523_v27, %v258_v28  ;;  %v525_v30 = vpop.eup %524 }
 0x17e   : > { %275 = vadd.xlane.f32.xlu0 %v274_v24  ;;  %v266_v35 = vmul.f32 %v525_v30, %v265_v32  ;;  %v272_v38 = vmul.f32 %v525_v30, %v271_v34 }
 0x205   : > { %v261_v31 = vpop.xlane.xlu0 %260 }
 0x206   : > { %v262_v33 = vadd.f32 %v261_v31, %v259_v29 }
 0x208   : > { %264 = vst.msk [vmem:[#allocation4] sm:$0xff] %vm218_vm0, %v262_v33 }
 0x209   : > { %v268_v36 = vpop.xlane.xlu1 %267 }
 0x20a   : > { %v269_v37 = vadd.f32 %v268_v36, %v266_v35 }
 0x20b   : > { %v276_v39 = vpop.xlane.xlu0 %275 }
 0x20c   : > { %270 = vst.msk [vmem:[#allocation5] sm:$0xff] %vm218_vm0, %v269_v37  ;;  %v277_v40 = vadd.f32 %v276_v39, %v272_v38 }
 0x20e   : > { %278 = vst.msk [vmem:[#allocation6] sm:$0xff] %vm218_vm0, %v277_v40 }
 0x20f   : > { %v292_v41 = vld [vmem:[#allocation4] sm:$0xff] }
 0x210   : > { %526 = vlog2.f32 %v292_v41 }
 0x213   : > { %v285_v42 = vld [vmem:[#allocation5] sm:$0xff] }
 0x214   : > { %528 = vrcp.f32 %v285_v42 }
 0x215   : > { %530 = vlog2.f32 %v285_v42  ;;  %v284_v46 = vld [vmem:[#allocation6] sm:$0xff] }
 0x21a   : > { %v527_v44 = vpop.eup %526 }
 0x21b   : > { %v294_v51 = vmul.f32 0.6931472, %v527_v44 }
 0x21e   : > { %v529_v45 = vpop.eup %528 }
 0x21f   : > { %v531_v48 = vpop.eup %530  ;;  %v287_v49 = vmul.f32 %v529_v45, %v284_v46 }
 0x220   : > { %v296_v52 = vmul.f32 0.6931472, %v531_v48 }
 0x221   : > { %v291_v53 = vsub.f32 %v287_v49, %v290_v50 }
 0x222   : > { %v297_v54 = vsub.f32 %v294_v51, %v296_v52 }
 0x224   : > { %v298_v55 = vadd.f32 %v297_v54, %v291_v53 }
 0x226   : > { %v299_v56 = vsel %vm218_vm0, %v298_v55, 0.0 }
 0x227   : > { %300 = vadd.xlane.f32.xlu0 %v299_v56 }
 0x2b4   : > { %v301_v57 = vpop.xlane.xlu0 %300 }
 0x2b5   : > { %v302_v58 = vrot.slane %v301_v57, 4 }
 0x2b7   : > { %v303_v59 = vadd.f32 %v302_v58, %v301_v57 }
 0x2b9   : > { %v304_v60 = vrot.slane %v303_v59, 2 }
 0x2bb   : > { %v305_v61 = vadd.f32 %v304_v60, %v303_v59 }
 0x2bd   : > { %v306_v62 = vrot.slane %v305_v61, 1 }
 0x2bf   : > { %v307_v63 = vadd.f32 %v306_v62, %v305_v61 }
 0x2c1   : > { %444 = vpush %v307_v63 }
 0x2f2   : > { %s445_s30 = spop %444 }
 0x2f3   : > { %v309_v0 = vstv %s445_s30 }
 0x2f4   : > { %310 = vst [vmem:[%s213_s21] sm:$0xff] %v309_v0 }
 0x2f5   : > { %605 = shalt.err (!%p602_p2)
}
 0x2f6   : > { %s606_s8 = scalar_lea.hbm %s890_s28, 128  ;;  %s610_s4 = scalar_lea.hbm %s939_s2, 256 }
 0x2f7   : > { %p607_p9 = scmp.ne.s32.totalorder %s890_s28, %s606_s8  ;;  %p611_p6 = scmp.lt.u32.totalorder %s890_s28, %s939_s2 }
 0x2f8   : > { %p612_p13 = scmp.lt.u32.totalorder %s610_s4, %s606_s8  ;;  %p614_p0 = scmp.lt.u32.totalorder %s606_s8, %s890_s28 }
 0x2f9   : > { %p608_p11 = pnand %p607_p9, %p952_p5 }
 0x2fa   : > { %p613_p8 = por %p612_p13, %p611_p6 }
 0x2fb   : > { %p609_p3 = pneg %p608_p11 }
 0x2fc   : > { %p615_p7 = por %p614_p0, %p613_p8 }
 0x2fe   : > { %p616_p4 = pnand %p615_p7, %p609_p3 }
 0x300   : > { %619 = shalt.err (!%p616_p4)
}
 0x301   : > { %450 = dma.vmem_to_hbm [thread:$0]  (%p952_p5), %s885_s16, 128, %s890_s28, %s312_s29  }
 0x302 PF: > { %s337_s7 = sand.u32 1, %s658_s9   ;;  %p953_p10 = scmp.ne.s32.totalorder %s945_s24, 0 }
 0x303   : > { %p954_p12 = scmp.ge.s32.totalorder %s678_s14, 2  ;;  %s338_s21 = scalar_lea.sflag [#allocation9], %s337_s7 }
 0x305   : > { %p460_p1 = pnand %p954_p12, %p953_p10 }
 0x307   : > { %653 = dma.done.wait (!%p460_p1), %s338_s21, 128  }
 0x308   : > { %655 = vsyncadd (!%p460_p1), %s338_s21, 4294967168  ;;  %s21_s14 = sadd.s32 1, %s678_s14   ;;  %s955_s9 = smov %s662_s10 }
 0x309   : > { %p18_p2 = scmp.ge.s32.totalorder %s21_s14, 4   ;;  %s956_s10 = smov %s666_s11 }
 0x30a   : > { %s957_s11 = smov %s757_s23  ;;  %s958_s12 = smov %s674_s13 }
 0x30b   : > { %s959_s13 = smov %s961_s17  ;;  %20 = sbr.rel (!%p18_p2) target bundleno = 8 (0x8), region = 94 }
 0x312   :  { %343 = vsyncpa [#allocation8], 1 }
 0x313   :  { %345 = vsyncpa [#allocation8 + $0x1], 1 }
 0x314   :  { %346 = vsyncpa [#allocation11], 1 }
 0x315   :  { %348 = vsyncpa [#allocation11 + $0x1], 1 }
 0x316   :  { %349 = vsyncpa [#allocation9], 1 }
 0x317   :  { %351 = vsyncpa [#allocation9 + $0x1], 1 }

</bundles_post_ra>
